<compile_context>
chip_gen: v7x
topology: tpu7x:2x2x1
jax: 0.10.0
libtpu: 0.0.40
codegen_flags: <defaults>
</compile_context>

<pallas_src>
import functools

import jax
import jax.numpy as jnp
from jax.experimental import pallas as pl
from jax.experimental.pallas import tpu as pltpu


# --------------------------------------------------------------------------- #
# Kernel body
# --------------------------------------------------------------------------- #
def _consty_body(compute_dtype, con_ref, sty_ref, wq_ref, wk_ref, bk_ref,
                 wv_ref, bv_ref, out_ref, attn_ref, q_scr):
    # con_ref : (C, Nc)   content, channels x flattened spatial (spatial on lanes)
    # sty_ref : (Cs, ts)  style tile
    # wq (A,C)  wk (A,Cs)  bk (A,1)  wv (Cs,Cs)  bv (Cs,1)
    # out_ref : (C, Nc)   resident accumulator across the style-tile axis
    # attn_ref: (ts, Nc)  or None
    # q_scr   : (A, Nc)   VMEM scratch holding the query projection
    j = pl.program_id(1)
    con = con_ref[...]                     # (C, Nc) f32
    sty = sty_ref[...]                     # (Cs, ts) f32

    # ---- once per batch element: query projection + residual init (gamma=1) ----
    @pl.when(j == 0)
    def _():
        # NOTE: the query bias (b_con) is intentionally omitted: it contributes a
        # per-style-column constant to the logits that cancels exactly in the
        # softmax over the content axis (torch dim=1) and never reaches `out`.
        q = jnp.dot(wq_ref[...], con, preferred_element_type=jnp.float32)  # (A, Nc)
        q_scr[...] = q.astype(q_scr.dtype)
        out_ref[...] = con                 # residual (gamma == 1)

    # ---- per style tile: key / value projections (1x1 convs == matmuls) ----
    k = jnp.dot(wk_ref[...], sty, preferred_element_type=jnp.float32) + bk_ref[...]  # (A, ts)
    v = jnp.dot(wv_ref[...], sty, preferred_element_type=jnp.float32) + bv_ref[...]  # (Cs, ts)

    # logits for this style tile, content on lanes: (ts, Nc).
    # Only a tiny (A, ts) transpose is needed; both big matmuls are standard NN.
    k_t = jnp.transpose(k).astype(compute_dtype)                                     # (ts, A)
    logits = jnp.dot(k_t, q_scr[...], preferred_element_type=jnp.float32)            # (ts, Nc)

    # softmax over the CONTENT axis (torch dim=1) == lane axis here.  Each style
    # column's softmax is independent, so the per-tile softmax is exact.
    m = jnp.max(logits, axis=-1, keepdims=True)
    e = jnp.exp(logits - m)
    # exact reciprocal kept (negligible cost; preserves tight fp32 tolerances)
    attn = e * pl.reciprocal(jnp.sum(e, axis=-1, keepdims=True), approx=False)       # (ts, Nc)

    if attn_ref is not None:
        attn_ref[...] = attn

    # out[c, n] += sum_m v[c, m] * attn[n, m]   (== torch bmm(V, attn^T)), fp32 acc
    out_ref[...] += jnp.dot(v.astype(compute_dtype), attn.astype(compute_dtype),
                            preferred_element_type=jnp.float32)


def _kernel_with_attn(compute_dtype, con_ref, sty_ref, wq_ref, wk_ref, bk_ref,
                      wv_ref, bv_ref, out_ref, attn_ref, q_scr):
    _consty_body(compute_dtype, con_ref, sty_ref, wq_ref, wk_ref, bk_ref,
                 wv_ref, bv_ref, out_ref, attn_ref, q_scr)


def _kernel_no_attn(compute_dtype, con_ref, sty_ref, wq_ref, wk_ref, bk_ref,
                    wv_ref, bv_ref, out_ref, q_scr):
    _consty_body(compute_dtype, con_ref, sty_ref, wq_ref, wk_ref, bk_ref,
                 wv_ref, bv_ref, out_ref, None, q_scr)


# --------------------------------------------------------------------------- #
# Wrapper
# --------------------------------------------------------------------------- #
def _pick_style_tile(ns):
    # Largest lane-aligned tile (multiple of 128) dividing Ns; otherwise one
    # tile spanning the whole (small / oddly-sized) style axis.
    for ts in (1024, 512, 256, 128):
        if ns % ts == 0:
            return ts
    return ns


def _vmem_limit_bytes(c, cs, a, nc, ts, return_attn):
    f32 = 4
    blocks = 2 * c * nc + 2 * cs * ts + 2 * c * nc          # double-buffered I/O
    if return_attn:
        blocks += 2 * ts * nc
    scratch = a * nc
    temps = 8 * ts * nc + 4 * a * nc + 4 * (a + cs) * ts     # logits/exp/attn/casts
    weights = a * c + a * cs + cs * cs + a + cs
    est = f32 * (blocks + scratch + temps + weights)
    return int(min(max(2 * est, 16 * 1024 * 1024), 64 * 1024 * 1024))


def consty_attention(con_nchw, style_nchw, params, *, return_attn=True,
                     compute_dtype=jnp.bfloat16, style_tile=None):
    """ConStyAttention forward.

    con_nchw:   (B, C, H, W)     style_nchw: (B, Cs, Hs, Ws)   (Cs must equal C)
    Returns (out NCHW, attn (B, Nc, Ns)) matching the PyTorch module;
    attn is None when return_attn=False (saves the largest HBM writeback).
    """
    B, C, H, W = con_nchw.shape
    Bs, Cs, Hs, Ws = style_nchw.shape
    assert Bs == B
    assert Cs == C, "residual (out.view + con) requires style_channels == con_channels"
    Nc, Ns = H * W, Hs * Ws
    A = params["w_con"].shape[0]

    # Pure reshapes: spatial goes to the lane (last) axis — no HBM transposes.
    con_flat = con_nchw.reshape(B, C, Nc).astype(jnp.float32)
    sty_flat = style_nchw.reshape(B, Cs, Ns).astype(jnp.float32)

    wq = params["w_con"].astype(jnp.float32)                    # (A, C)
    wk = params["w_sty"].astype(jnp.float32)                    # (A, Cs)
    bk = params["b_sty"].astype(jnp.float32).reshape(A, 1)
    wv = params["w_v"].astype(jnp.float32)                      # (Cs, Cs)
    bv = params["b_v"].astype(jnp.float32).reshape(Cs, 1)
    # params["b_con"] is unused on purpose (cancels in the content-axis softmax).

    ts = style_tile if style_tile is not None else _pick_style_tile(Ns)
    assert Ns % ts == 0 and (ts == Ns or ts % 128 == 0)
    n_tiles = Ns // ts

    full = lambda b, j: (0, 0)
    in_specs = [
        pl.BlockSpec((None, C, Nc), lambda b, j: (b, 0, 0)),    # content (resident over j)
        pl.BlockSpec((None, Cs, ts), lambda b, j: (b, 0, j)),   # style tile
        pl.BlockSpec((A, C), full),
        pl.BlockSpec((A, Cs), full),
        pl.BlockSpec((A, 1), full),
        pl.BlockSpec((Cs, Cs), full),
        pl.BlockSpec((Cs, 1), full),
    ]
    out_spec_o = pl.BlockSpec((None, C, Nc), lambda b, j: (b, 0, 0))  # accumulator

    if return_attn:
        out_shape = (jax.ShapeDtypeStruct((B, C, Nc), jnp.float32),
                     jax.ShapeDtypeStruct((B, Ns, Nc), jnp.float32))
        out_specs = [out_spec_o,
                     pl.BlockSpec((None, ts, Nc), lambda b, j: (b, j, 0))]
        kernel = functools.partial(_kernel_with_attn, compute_dtype)
    else:
        out_shape = jax.ShapeDtypeStruct((B, C, Nc), jnp.float32)
        out_specs = out_spec_o
        kernel = functools.partial(_kernel_no_attn, compute_dtype)

    result = pl.pallas_call(
        kernel,
        out_shape=out_shape,
        grid_spec=pltpu.PrefetchScalarGridSpec(
            num_scalar_prefetch=0,
            grid=(B, n_tiles),                       # style-tile (reduction) axis last
            in_specs=in_specs,
            out_specs=out_specs,
            scratch_shapes=[pltpu.VMEM((A, Nc), compute_dtype)],   # query projection
        ),
        compiler_params=pltpu.CompilerParams(
            dimension_semantics=("parallel", "arbitrary"),
            vmem_limit_bytes=_vmem_limit_bytes(C, Cs, A, Nc, ts, return_attn),
        ),
    )(con_flat, sty_flat, wq, wk, bk, wv, bv)

    if return_attn:
        out_flat, attn_t = result
        attn = jnp.swapaxes(attn_t, 1, 2)            # (B, Nc, Ns): torch layout
    else:
        out_flat, attn = result, None

    out_nchw = out_flat.reshape(B, C, H, W)          # pure reshape, matches torch .view
    return out_nchw, attn


# --------------------------------------------------------------------------- #
# Pure-JAX reference mirroring the PyTorch forward exactly
# --------------------------------------------------------------------------- #
def _reference(con_nchw, style_nchw, params):
    B, C, H, W = con_nchw.shape
    Cs = style_nchw.shape[1]

    def conv1x1(x, w, b):  # x: (B, Cin, H, W), w: (Cout, Cin), b: (Cout,)
        return jnp.einsum("bihw,oi->bohw", x, w) + b[None, :, None, None]

    con_q = conv1x1(con_nchw, params["w_con"], params["b_con"])
    sty_k = conv1x1(style_nchw, params["w_sty"], params["b_sty"])
    sty_v = conv1x1(style_nchw, params["w_v"], params["b_v"])

    con_q_t = jnp.transpose(con_q.reshape(B, con_q.shape[1], -1), (0, 2, 1))
    sty_k_f = sty_k.reshape(B, sty_k.shape[1], -1)
    logits = jnp.einsum("bnc,bcm->bnm", con_q_t, sty_k_f)
    attn = jax.nn.softmax(logits, axis=1)                          # torch dim=1
    out = jnp.einsum("bcm,bnm->bcn", sty_v.reshape(B, Cs, -1), attn)
    out = out.reshape(B, C, H, W) + con_nchw                       # gamma = 1
    return out, attn


# --------------------------------------------------------------------------- #
# Demo / self-test
# --------------------------------------------------------------------------- #
if __name__ == "__main__":
    B = 2
    con_channels = 8
    style_channels = 8       # must equal con_channels (torch's .view requires it)
    attn_channels = 16
    H = W = 16               # content spatial -> Nc = 256 (lane-dense)
    Hs, Ws = 32, 16          # style spatial   -> Ns = 512 (exercises Ns tiling)

    key = jax.random.PRNGKey(0)
    k = jax.random.split(key, 8)
    con = jax.random.normal(k[0], (B, con_channels, H, W), jnp.float32)
    style = jax.random.normal(k[1], (B, style_channels, Hs, Ws), jnp.float32)

    params = {
        "w_con": 0.1 * jax.random.normal(k[2], (attn_channels, con_channels), jnp.float32),
        "b_con": 0.05 * jax.random.normal(k[3], (attn_channels,), jnp.float32),
        "w_sty": 0.1 * jax.random.normal(k[4], (attn_channels, style_channels), jnp.float32),
        "b_sty": 0.05 * jax.random.normal(k[5], (attn_channels,), jnp.float32),
        "w_v": 0.1 * jax.random.normal(k[6], (style_channels, style_channels), jnp.float32),
        "b_v": 0.05 * jax.random.normal(k[7], (style_channels,), jnp.float32),
    }

    ref_out, ref_attn = _reference(con, style, params)

    # 1) fp32 compute path, 4 style tiles (output accumulator exercised): tight tolerances.
    out32, attn32 = consty_attention(con, style, params,
                                     compute_dtype=jnp.float32, style_tile=128)
    out32 = jax.block_until_ready(out32)
    attn32 = jax.block_until_ready(attn32)
    assert out32.shape == (B, con_channels, H, W)
    assert attn32.shape == (B, H * W, Hs * Ws)
    assert jnp.allclose(out32, ref_out, atol=1e-4, rtol=1e-4)
    assert jnp.allclose(attn32, ref_attn, atol=1e-5, rtol=1e-5)

    # 2) default bf16 MXU path (fp32 accumulation), single style tile.
    out_bf, attn_bf = consty_attention(con, style, params)
    out_bf = jax.block_until_ready(out_bf)
    attn_bf = jax.block_until_ready(attn_bf)
    assert jnp.allclose(out_bf, ref_out, atol=5e-2, rtol=5e-2)
    assert jnp.allclose(attn_bf, ref_attn, atol=5e-3, rtol=5e-2)

    # 3) out-only variant (skips the attention-matrix HBM writeback), 2 style tiles.
    out_na, attn_none = consty_attention(con, style, params,
                                         return_attn=False, style_tile=256)
    out_na = jax.block_until_ready(out_na)
    assert attn_none is None
    assert out_na.shape == (B, con_channels, H, W)
    assert jnp.allclose(out_na, ref_out, atol=5e-2, rtol=5e-2)

    print("KERNEL_OK")
</pallas_src>

<mosaic_0001>
module attributes {stable_mosaic.version = 11 : i64} {
  func.func @_kernel_with_attn(%arg0: i32, %arg1: i32, %arg2: memref<1x8x256xf32, #tpu.memory_space<vmem>>, %arg3: memref<1x8x128xf32, #tpu.memory_space<vmem>>, %arg4: memref<16x8xf32, #tpu.memory_space<vmem>>, %arg5: memref<16x8xf32, #tpu.memory_space<vmem>>, %arg6: memref<16x1xf32, #tpu.memory_space<vmem>>, %arg7: memref<8x8xf32, #tpu.memory_space<vmem>>, %arg8: memref<8x1xf32, #tpu.memory_space<vmem>>, %arg9: memref<1x8x256xf32, #tpu.memory_space<vmem>>, %arg10: memref<1x128x256xf32, #tpu.memory_space<vmem>>, %arg11: memref<16x256xf32, #tpu.memory_space<vmem>>) attributes {dimension_semantics = [#tpu.dimension_semantics<parallel>, #tpu.dimension_semantics<arbitrary>], iteration_bounds = array<i64: 2, 4>, scalar_prefetch = 0 : i64, scratch_operands = 1 : i64, tpu.core_type = #tpu.core_type<tc>, window_params = [{transform_indices = @transform_0, window_bounds = array<i64: 1, 8, 256>}, {transform_indices = @transform_1, window_bounds = array<i64: 1, 8, 128>}, {pipeline_mode = #tpu.pipeline_mode<synchronous>, transform_indices = @transform_2, window_bounds = array<i64: 16, 8>}, {pipeline_mode = #tpu.pipeline_mode<synchronous>, transform_indices = @transform_3, window_bounds = array<i64: 16, 8>}, {pipeline_mode = #tpu.pipeline_mode<synchronous>, transform_indices = @transform_4, window_bounds = array<i64: 16, 1>}, {pipeline_mode = #tpu.pipeline_mode<synchronous>, transform_indices = @transform_5, window_bounds = array<i64: 8, 8>}, {pipeline_mode = #tpu.pipeline_mode<synchronous>, transform_indices = @transform_6, window_bounds = array<i64: 8, 1>}, {transform_indices = @transform_7, window_bounds = array<i64: 1, 8, 256>}, {transform_indices = @transform_8, window_bounds = array<i64: 1, 128, 256>}]} {
    %c0 = arith.constant 0 : index
    %c0_0 = arith.constant 0 : index
    %c0_1 = arith.constant 0 : index
    %0 = vector.load %arg2[%c0, %c0_0, %c0_1] : memref<1x8x256xf32, #tpu.memory_space<vmem>>, vector<1x8x256xf32>
    %1 = vector.shape_cast %0 : vector<1x8x256xf32> to vector<8x256xf32>
    %c0_2 = arith.constant 0 : index
    %c0_3 = arith.constant 0 : index
    %c0_4 = arith.constant 0 : index
    %2 = vector.load %arg3[%c0_2, %c0_3, %c0_4] : memref<1x8x128xf32, #tpu.memory_space<vmem>>, vector<1x8x128xf32>
    %3 = vector.shape_cast %2 : vector<1x8x128xf32> to vector<8x128xf32>
    %c0_i32 = arith.constant 0 : i32
    %4 = arith.cmpi eq, %arg1, %c0_i32 : i32
    %5 = arith.extui %4 : i1 to i32
    %c0_i32_5 = arith.constant 0 : i32
    %6 = arith.cmpi ne, %5, %c0_i32_5 : i32
    scf.if %6 {
      %c0_30 = arith.constant 0 : index
      %c0_31 = arith.constant 0 : index
      %40 = vector.load %arg4[%c0_30, %c0_31] : memref<16x8xf32, #tpu.memory_space<vmem>>, vector<16x8xf32>
      %cst_32 = arith.constant dense<0.000000e+00> : vector<16x256xf32>
      %41 = tpu.matmul %40, %1, %cst_32 {dimension_numbers = #tpu.dot_dimension_numbers<[1], [0], [0], [1], [0, 0, 1, 1], [], []>} : vector<16x8xf32>, vector<8x256xf32>, vector<16x256xf32> -> vector<16x256xf32>
      %c0_33 = arith.constant 0 : index
      %c0_34 = arith.constant 0 : index
      %42 = vector.load %arg11[%c0_33, %c0_34] : memref<16x256xf32, #tpu.memory_space<vmem>>, vector<16x256xf32>
      tpu.vector_store %arg11[%c0_33, %c0_34], %41 {strides = array<i32>} : memref<16x256xf32, #tpu.memory_space<vmem>>, vector<16x256xf32>,
      %c0_35 = arith.constant 0 : index
      %c0_36 = arith.constant 0 : index
      %c0_37 = arith.constant 0 : index
      %43 = vector.load %arg9[%c0_35, %c0_36, %c0_37] : memref<1x8x256xf32, #tpu.memory_space<vmem>>, vector<1x8x256xf32>
      %44 = vector.shape_cast %43 : vector<1x8x256xf32> to vector<8x256xf32>
      %45 = vector.shape_cast %1 : vector<8x256xf32> to vector<1x8x256xf32>
      tpu.vector_store %arg9[%c0_35, %c0_36, %c0_37], %45 {strides = array<i32>} : memref<1x8x256xf32, #tpu.memory_space<vmem>>, vector<1x8x256xf32>,
    } else {
    }
    %c0_6 = arith.constant 0 : index
    %c0_7 = arith.constant 0 : index
    %7 = vector.load %arg5[%c0_6, %c0_7] : memref<16x8xf32, #tpu.memory_space<vmem>>, vector<16x8xf32>
    %cst = arith.constant dense<0.000000e+00> : vector<16x128xf32>
    %8 = tpu.matmul %7, %3, %cst {dimension_numbers = #tpu.dot_dimension_numbers<[1], [0], [0], [1], [0, 0, 1, 1], [], []>} : vector<16x8xf32>, vector<8x128xf32>, vector<16x128xf32> -> vector<16x128xf32>
    %c0_8 = arith.constant 0 : index
    %c0_9 = arith.constant 0 : index
    %9 = vector.load %arg6[%c0_8, %c0_9] : memref<16x1xf32, #tpu.memory_space<vmem>>, vector<16x1xf32>
    %10 = vector.broadcast %9 : vector<16x1xf32> to vector<16x128xf32>
    %11 = arith.addf %8, %10 : vector<16x128xf32>
    %c0_10 = arith.constant 0 : index
    %c0_11 = arith.constant 0 : index
    %12 = vector.load %arg7[%c0_10, %c0_11] : memref<8x8xf32, #tpu.memory_space<vmem>>, vector<8x8xf32>
    %cst_12 = arith.constant dense<0.000000e+00> : vector<8x128xf32>
    %13 = tpu.matmul %12, %3, %cst_12 {dimension_numbers = #tpu.dot_dimension_numbers<[1], [0], [0], [1], [0, 0, 1, 1], [], []>} : vector<8x8xf32>, vector<8x128xf32>, vector<8x128xf32> -> vector<8x128xf32>
    %c0_13 = arith.constant 0 : index
    %c0_14 = arith.constant 0 : index
    %14 = vector.load %arg8[%c0_13, %c0_14] : memref<8x1xf32, #tpu.memory_space<vmem>>, vector<8x1xf32>
    %15 = vector.broadcast %14 : vector<8x1xf32> to vector<8x128xf32>
    %16 = arith.addf %13, %15 : vector<8x128xf32>
    %17 = tpu.transpose %11, [1, 0] : vector<16x128xf32> -> vector<128x16xf32>
    %c0_15 = arith.constant 0 : index
    %c0_16 = arith.constant 0 : index
    %18 = vector.load %arg11[%c0_15, %c0_16] : memref<16x256xf32, #tpu.memory_space<vmem>>, vector<16x256xf32>
    %cst_17 = arith.constant dense<0.000000e+00> : vector<128x256xf32>
    %19 = tpu.matmul %17, %18, %cst_17 {dimension_numbers = #tpu.dot_dimension_numbers<[1], [0], [0], [1], [0, 0, 1, 1], [], []>} : vector<128x16xf32>, vector<16x256xf32>, vector<128x256xf32> -> vector<128x256xf32>
    %cst_18 = arith.constant dense<0xFF800000> : vector<128xf32>
    %20 = vector.multi_reduction <maximumf>, %19, %cst_18 [1] : vector<128x256xf32> to vector<128xf32>
    %21 = vector.shape_cast %20 : vector<128xf32> to vector<128x1xf32>
    %22 = vector.broadcast %21 : vector<128x1xf32> to vector<128x256xf32>
    %23 = arith.subf %19, %22 : vector<128x256xf32>
    %24 = math.exp %23 : vector<128x256xf32>
    %cst_19 = arith.constant dense<0.000000e+00> : vector<128xf32>
    %25 = vector.multi_reduction <add>, %24, %cst_19 [1] : vector<128x256xf32> to vector<128xf32>
    %26 = vector.shape_cast %25 : vector<128xf32> to vector<128x1xf32>
    %27 = tpu.reciprocal %26 : vector<128x1xf32> -> vector<128x1xf32>
    %28 = vector.broadcast %27 : vector<128x1xf32> to vector<128x256xf32>
    %29 = arith.mulf %24, %28 : vector<128x256xf32>
    %c0_20 = arith.constant 0 : index
    %c0_21 = arith.constant 0 : index
    %c0_22 = arith.constant 0 : index
    %30 = vector.load %arg10[%c0_20, %c0_21, %c0_22] : memref<1x128x256xf32, #tpu.memory_space<vmem>>, vector<1x128x256xf32>
    %31 = vector.shape_cast %30 : vector<1x128x256xf32> to vector<128x256xf32>
    %32 = vector.shape_cast %29 : vector<128x256xf32> to vector<1x128x256xf32>
    tpu.vector_store %arg10[%c0_20, %c0_21, %c0_22], %32 {strides = array<i32>} : memref<1x128x256xf32, #tpu.memory_space<vmem>>, vector<1x128x256xf32>,
    %c0_23 = arith.constant 0 : index
    %c0_24 = arith.constant 0 : index
    %c0_25 = arith.constant 0 : index
    %33 = vector.load %arg9[%c0_23, %c0_24, %c0_25] : memref<1x8x256xf32, #tpu.memory_space<vmem>>, vector<1x8x256xf32>
    %34 = vector.shape_cast %33 : vector<1x8x256xf32> to vector<8x256xf32>
    %cst_26 = arith.constant dense<0.000000e+00> : vector<8x256xf32>
    %35 = tpu.matmul %16, %29, %cst_26 {dimension_numbers = #tpu.dot_dimension_numbers<[1], [0], [0], [1], [0, 0, 1, 1], [], []>} : vector<8x128xf32>, vector<128x256xf32>, vector<8x256xf32> -> vector<8x256xf32>
    %36 = arith.addf %34, %35 : vector<8x256xf32>
    %c0_27 = arith.constant 0 : index
    %c0_28 = arith.constant 0 : index
    %c0_29 = arith.constant 0 : index
    %37 = vector.load %arg9[%c0_27, %c0_28, %c0_29] : memref<1x8x256xf32, #tpu.memory_space<vmem>>, vector<1x8x256xf32>
    %38 = vector.shape_cast %37 : vector<1x8x256xf32> to vector<8x256xf32>
    %39 = vector.shape_cast %36 : vector<8x256xf32> to vector<1x8x256xf32>
    tpu.vector_store %arg9[%c0_27, %c0_28, %c0_29], %39 {strides = array<i32>} : memref<1x8x256xf32, #tpu.memory_space<vmem>>, vector<1x8x256xf32>,
    return
  }
  func.func @transform_0(%arg0: i32, %arg1: i32) -> (i32, i32, i32) {
    %c0_i32 = arith.constant 0 : i32
    %c0_i32_0 = arith.constant 0 : i32
    %c0_i32_1 = arith.constant 0 : i32
    return %arg0, %c0_i32, %c0_i32_0 : i32, i32, i32
  }
  func.func @transform_1(%arg0: i32, %arg1: i32) -> (i32, i32, i32) {
    %c0_i32 = arith.constant 0 : i32
    %c0_i32_0 = arith.constant 0 : i32
    return %arg0, %c0_i32, %arg1 : i32, i32, i32
  }
  func.func @transform_2(%arg0: i32, %arg1: i32) -> (i32, i32) {
    %c0_i32 = arith.constant 0 : i32
    %c0_i32_0 = arith.constant 0 : i32
    %c0_i32_1 = arith.constant 0 : i32
    return %c0_i32, %c0_i32_0 : i32, i32
  }
  func.func @transform_3(%arg0: i32, %arg1: i32) -> (i32, i32) {
    %c0_i32 = arith.constant 0 : i32
    %c0_i32_0 = arith.constant 0 : i32
    %c0_i32_1 = arith.constant 0 : i32
    return %c0_i32, %c0_i32_0 : i32, i32
  }
  func.func @transform_4(%arg0: i32, %arg1: i32) -> (i32, i32) {
    %c0_i32 = arith.constant 0 : i32
    %c0_i32_0 = arith.constant 0 : i32
    %c0_i32_1 = arith.constant 0 : i32
    return %c0_i32, %c0_i32_0 : i32, i32
  }
  func.func @transform_5(%arg0: i32, %arg1: i32) -> (i32, i32) {
    %c0_i32 = arith.constant 0 : i32
    %c0_i32_0 = arith.constant 0 : i32
    %c0_i32_1 = arith.constant 0 : i32
    return %c0_i32, %c0_i32_0 : i32, i32
  }
  func.func @transform_6(%arg0: i32, %arg1: i32) -> (i32, i32) {
    %c0_i32 = arith.constant 0 : i32
    %c0_i32_0 = arith.constant 0 : i32
    %c0_i32_1 = arith.constant 0 : i32
    return %c0_i32, %c0_i32_0 : i32, i32
  }
  func.func @transform_7(%arg0: i32, %arg1: i32) -> (i32, i32, i32) {
    %c0_i32 = arith.constant 0 : i32
    %c0_i32_0 = arith.constant 0 : i32
    %c0_i32_1 = arith.constant 0 : i32
    return %arg0, %c0_i32, %c0_i32_0 : i32, i32, i32
  }
  func.func @transform_8(%arg0: i32, %arg1: i32) -> (i32, i32, i32) {
    %c0_i32 = arith.constant 0 : i32
    %c0_i32_0 = arith.constant 0 : i32
    return %arg0, %arg1, %c0_i32 : i32, i32, i32
  }
}

</mosaic_0001>

<bundles_post_ra>
// kernel: tpu_custom_call.1
= control target key start
LH: loop header
LB: loop body
LE: loop exit
PB: predicated region body
PF: predicated region fallthrough
CT: control target
= control target key end

     0   :  { %s2635_s0 = inlined_call_operand.hbm [shape: f32[2,8,256], index: 0, kind: input, shape index: {}]   ;;  %s2636_s1 = inlined_call_operand.vmem [shape: f32[2,8,512], index: 1, kind: input, shape index: {}]   ;;  %s2637_s2 = inlined_call_operand.vmem [shape: f32[16,8], index: 2, kind: input, shape index: {}]   ;;  %s2638_s3 = inlined_call_operand.vmem [shape: f32[16,8], index: 3, kind: input, shape index: {}]   ;;  %s2639_s4 = inlined_call_operand.vmem [shape: f32[16,1], index: 4, kind: input, shape index: {}]   ;;  %s2640_s5 = inlined_call_operand.vmem [shape: f32[8,8], index: 5, kind: input, shape index: {}]   ;;  %s2641_s6 = inlined_call_operand.vmem [shape: f32[8,1], index: 6, kind: input, shape index: {}]   ;;  %s2642_s7 = inlined_call_operand.hbm [shape: f32[2,8,256], index: 7, kind: output, shape index: {0}]   ;;  %s2643_s8 = inlined_call_operand.hbm [shape: f32[2,512,256], index: 8, kind: output, shape index: {1}]  }
   0x1   :  { %2657 = sst [smem:[#allocation21_spill]] %s2635_s0 }
   0x2   :  { %2658 = sst [smem:[#allocation22_spill]] %s2642_s7 }
   0x3   :  { %2659 = sst [smem:[#allocation23_spill]] %s2643_s8 }
   0x4   :  { %14 = vsyncpa [#allocation4], 0 }
   0x5   :  { %16 = vsyncpa [#allocation4 + $0x1], 0 }
   0x6   :  { %17 = vsyncpa [#allocation5], 0 }
   0x7   :  { %19 = vsyncpa [#allocation5 + $0x1], 0 }
   0x8   :  { %20 = vsyncpa [#allocation8], 0 }
   0x9   :  { %22 = vsyncpa [#allocation8 + $0x1], 0  ;;  %s1973_s27 = smov 0   ;;  %s1975_s28 = smov 0  }
   0xa   :  { %s1977_s29 = smov 0   ;;  %s1979_s30 = smov 0  }
   0xb   :  { %s1981_s9 = smov 0   ;;  %s1983_s10 = smov 0  }
   0xc   :  { %s1985_s11 = smov 0   ;;  %s1987_s12 = smov 0  }
   0xd   :  { %s1989_s13 = smov 0   ;;  %s1991_s14 = smov 0  }
   0xe   :  { %s1993_s15 = smov 0  }
   0xf LB: > { %2660 = sst [smem:[#allocation12_spill]] %s1889_s30  ;;  %s1422_s16 = sadd.s32 4294967295, %s1917_s15   ;;  %s1917_s15 = sphi %s1993_s15, %s28_s15   ;;  %s1913_s14 = sphi %s1991_s14, %s2696_s14   ;;  %s1909_s13 = sphi %s1989_s13, %s2695_s13   ;;  %s1905_s12 = sphi %s1987_s12, %s2694_s12   ;;  %s1901_s11 = sphi %s1985_s11, %s2693_s11   ;;  %s1897_s10 = sphi %s1983_s10, %s2692_s10   ;;  %s1893_s9 = sphi %s1981_s9, %s2691_s9   ;;  %s1889_s30 = sphi %s1979_s30, %s2690_s30   ;;  %s1885_s29 = sphi %s1977_s29, %s2699_s29   ;;  %s1881_s28 = sphi %s1975_s28, %s2698_s28   ;;  %s1877_s27 = sphi %s1973_s27, %s2697_s27  }
  0x10   : > { %2661 = sst [smem:[#allocation13_spill]] %s1893_s9  ;;  %s1423_s17 = sadd.s32 4294967294, %s1917_s15  }
  0x11   : > { %2662 = sst [smem:[#allocation14_spill]] %s1897_s10  ;;  %s37_s18 = sadd.s32 1, %s1909_s13 }
  0x12   : > { %2663 = sst [smem:[#allocation15_spill]] %s1909_s13  ;;  %s40_s19 = sadd.s32 1, %s1913_s14 }
  0x13   : > { %2664 = sst [smem:[#allocation16_spill]] %s1913_s14  ;;  %p38_p0 = scmp.ge.s32.totalorder %s37_s18, 4 }
  0x14   : > { %s47_s20 = sadd.s32 1, %s1897_s10  ;;  %p54_p1 = scmp.ne.s32.totalorder %s1897_s10, %s1893_s9 }
  0x15   : > { %p55_p2 = scmp.eq.s32.totalorder %s1917_s15, 0  ;;  %s2701_s18 = smov (%p38_p0, %s37_s18), 0 }
  0x16   : > { %2665 = sst [smem:[#allocation17_spill]] %s2701_s18  ;;  %s2703_s19 = smov (!%p38_p0, %s40_s19), %s1913_s14 }
  0x17   : > { %p2039_p3 = por %p55_p2, %p54_p1  ;;  %p60_p4 = scmp.ne.s32.totalorder %s1893_s9, %s1889_s30 }
  0x18   : > { %p42_p5 = scmp.ge.s32.totalorder %s2703_s19, 2  ;;  %p61_p6 = scmp.eq.s32.totalorder %s1422_s16, 0 }
  0x19   : > { %p2045_p7 = scmp.eq.s32.totalorder %s1422_s16, 7  ;;  %p2049_p8 = scmp.eq.s32.totalorder %s1423_s17, 7 }
  0x1a   : > { %s2705_s19 = smov (%p42_p5, %s2703_s19), 0  ;;  %p2055_p9 = por %p61_p6, %p60_p4 }
  0x1b   : > { %2669 = sst [smem:[#allocation18_spill]] %s2705_s19  ;;  %p2061_p10 = por %p2045_p7, %p54_p1 }
  0x1c   : > { %s44_s26 = ssub.s32 %s1913_s14, %s2705_s19  ;;  %p2069_p11 = por %p2049_p8, %p60_p4 }
  0x1d   : > { %s2671_s25 = scalar_select %p2061_p10, 1, 0 }
  0x1e   : > { %s2673_s16 = scalar_select %p2069_p11, 1, 0 }
  0x1f   : > { %2672 = sst [smem:[#allocation19_spill]] %s2671_s25  ;;  %p45_p12 = scmp.eq.s32.totalorder %s44_s26, 0 }
  0x20   : > { %s230_s17 = ssub.s32 %s1909_s13, %s2701_s18  ;;  %s234_s7 = sadd.s32 1, %s1885_s29 }
  0x21   : > { %s231_s30 = sor.u32 %s230_s17, %s44_s26  ;;  %p244_p0 = scmp.ne.s32.totalorder %s1885_s29, %s1881_s28 }
  0x22   : > { %s2077_s8 = scalar_select %p45_p12, %s1897_s10, %s47_s20  }
  0x23   : > { %p232_p13 = scmp.eq.s32.totalorder %s231_s30, 0  ;;  %p250_p1 = scmp.ne.s32.totalorder %s1881_s28, %s1877_s27 }
  0x24   : > { %2674 = sst [smem:[#allocation20_spill]] %s2077_s8  ;;  %p2088_p2 = por %p244_p0, %p2045_p7 }
  0x25   : > { %s2084_s25 = scalar_select %p232_p13, %s1885_s29, %s234_s7  }
  0x26   : > { %s2675_s19 = scalar_select %p2088_p2, 1, 0 }
  0x27   : > { %p2094_p4 = por %p250_p1, %p2049_p8  ;;  %p1540_p5 = scmp.lt.s32.totalorder %s1917_s15, 8 }
  0x28   : > { %s286_s20 = sand.u32 1, %s1897_s10   ;;  %s1467_s17 = sshll.u32 %s1913_s14, 8 }
  0x29   : > { %s2676_s18 = scalar_select %p2094_p4, 1, 0 }
  0x2a   : > { %s1426_s26 = sshll.u32 %s286_s20, 4  ;;  %s2677_s0 = sld [smem:[#allocation21_spill]] }
  0x2b   : > { %s290_s7 = scalar_lea.vmem [#allocation3], %s1426_s26  ;;  %p2110_p6 = pnand %p1540_p5, %p2039_p3 }
  0x2c   : > { %s298_s22 = sshll.u32 %s290_s7, 4  ;;  %s287_s13 = scalar_lea.sflag [#allocation4], %s286_s20  ;;  %s2106_s22 = int_to_ptr.vmem [resolvable:$true] %s298_s22 }
  0x2d   : > { %p1735_p13 = pneg %p2110_p6 }
  0x30   : > { %s2104_s8 = scalar_lea.hbm %s2677_s0, %s1467_s17  ;;  %s1738_s21 = scalar_lea.hbm %s2677_s0, 512 }
  0x31   : > { %s1733_s17 = scalar_lea.hbm %s2104_s8, 256  ;;  %p1739_p3 = scmp.lt.u32.totalorder %s2104_s8, %s2677_s0 }
  0x32   : > { %p1734_p12 = scmp.ne.s32.totalorder %s2104_s8, %s1733_s17  ;;  %p1740_p5 = scmp.lt.u32.totalorder %s1738_s21, %s1733_s17 }
  0x33   : > { %p1742_p8 = scmp.lt.u32.totalorder %s1733_s17, %s2104_s8 }
  0x34   : > { %p1736_p0 = pnand %p1735_p13, %p1734_p12  ;;  %p1741_p7 = por %p1740_p5, %p1739_p3 }
  0x36   : > { %p1737_p1 = pneg %p1736_p0  ;;  %p1743_p4 = por %p1742_p8, %p1741_p7 }
  0x38   : > { %p1744_p11 = pnand %p1743_p4, %p1737_p1 }
  0x3a   : > { %1747 = shalt.err (!%p1744_p11)
}
  0x3b   : > { %s1748_s20 = scalar_lea.vmem %s2106_s22, 256  ;;  %s1919_s26 = smov [#allocation3]  }
  0x3c   : > { %p1749_p12 = scmp.ne.s32.totalorder %s2106_s22, %s1748_s20  ;;  %s1753_s30 = sshll.u32 %s1919_s26, 4  ;;  %s1754_s30 = int_to_ptr.vmem [resolvable:$false] %s1753_s30 }
  0x3d   : > { %s1755_s14 = scalar_lea.vmem %s1754_s30, 512  ;;  %p1756_p2 = scmp.lt.s32.totalorder %s2106_s22, %s1754_s30 }
  0x3e   : > { %p1751_p0 = pnand %p1749_p12, %p1735_p13  ;;  %p1757_p3 = scmp.lt.s32.totalorder %s1755_s14, %s1748_s20 }
  0x40   : > { %p1752_p10 = pneg %p1751_p0  ;;  %p1758_p5 = por %p1757_p3, %p1756_p2 }
  0x42   : > { %p1759_p7 = pnand %p1758_p5, %p1752_p10 }
  0x44   : > { %1762 = shalt.err (!%p1759_p7)
}
  0x45   : > { %1532 = dma.hbm_to_vmem [thread:$0]  (!%p2110_p6), %s2104_s8, 256, %s2106_s22, %s287_s13  }
  0x46   : > { %p2679_p11 = scmp.lt.s32.totalorder %s1917_s15, 9  ;;  %p2680_p4 = scmp.ge.s32.totalorder %s1917_s15, 1 }
  0x48   : > { %p315_p8 = pnand %p2680_p4, %p2679_p11 }
  0x49   : > { %s2146_s17 = sand.u32 (!%p315_p8), 1, %s1893_s9  }
  0x4a   : > { %318 = sbr.rel (%p315_p8) target bundleno = 1477 (0x5c5), region = 48  ;;  %s1430_s21 = sshll.u32 (!%p315_p8), %s2146_s17, 4 }
  0x4b   : > { %s321_s7 = scalar_lea.sflag (!%p315_p8), [#allocation4], %s2146_s17  ;;  %s324_s20 = scalar_lea.vmem (!%p315_p8), [#allocation3], %s1430_s21 }
  0x51   : > { %1864 = dma.done.wait (%p2055_p9), %s321_s7, 256  }
  0x52   : > { %1866 = vsyncadd (%p2055_p9), %s321_s7, 4294967040  ;;  %p370_p10 = scmp.lt.s32.totalorder %s1905_s12, 1  ;;  %p372_p2 = scmp.lt.s32.totalorder %s1901_s11, 3  ;;  %v379_v0 = vld [vmem:[%s324_s20] sm:$0xff]  ;;  %v380_v1 = vld [vmem:[%s324_s20 + $0x8] sm:$0xff] }
  0x53   : > { %s367_s8 = sand.u32 1, %s1881_s28   ;;  %s2164_s7 = scalar_lea.vmem [#allocation6], %s1430_s21 }
  0x54   : > { %s371_s22 = scalar_select %p370_p10, %s1905_s12, 1 }
  0x55   : > { %s373_s23 = scalar_select %p372_p2, %s1901_s11, 3 }
  0x56   : > { %s1433_s13 = sshll.u32 %s371_s22, 2  ;;  %s1432_s26 = sshll.u32 %s367_s8, 8 }
  0x57   : > { %s375_s30 = sadd.s32 %s1433_s13, %s373_s23  ;;  %s2166_s9 = scalar_lea.vmem [#allocation7], %s1432_s26 }
  0x58   : > { %s1434_s14 = sshll.u32 %s375_s30, 3  ;;  %p1435_p9 = scmp.ne.s32.totalorder %s1901_s11, 0 }
  0x59   : > { %s377_s24 = scalar_lea.vmem %s2636_s1, %s1434_s14  ;;  %395 = vmatprep.subr.mxu0 (!%p1435_p9), %v380_v1  ;;  %1521 = vmatprep.subr.mxu1 (!%p1435_p9), %v380_v1  ;;  %v386_v3 = vld [vmem:[%s2637_s2] sm:$0xff] (!%p1435_p9)  ;;  %vm388_vm0 = vcmask (!%p1435_p9), 64512   ;;  %v387_v4 = vld [vmem:[%s2637_s2 + $0x8] sm:$0xff] (!%p1435_p9)  ;;  %476 = vst [vmem:[%s2164_s7] sm:$0xff] (!%p1435_p9), %v379_v0  ;;  %477 = vst [vmem:[%s2164_s7 + $0x8] sm:$0xff] (!%p1435_p9), %v380_v1  ;;  %v1920_v5 = vmov (!%p1435_p9), 0.0  }
  0x5a   : > { %v381_v2 = vld [vmem:[%s377_s24] sm:$0xff]  ;;  %385 = sbr.rel (%p1435_p9) target bundleno = 306 (0x132), region = 56  ;;  %396 = vmatpush1.msra.mxu0 (!%p1435_p9), %v379_v0  ;;  %1522 = vmatpush1.msra.mxu1 (!%p1435_p9), %v379_v0 }
  0x5b   : > { %459 = vmatprep.mubr.f32.mxu0 (!%p1435_p9), %v1920_v5  ;;  %465 = vmatprep.mubr.f32.mxu1 (!%p1435_p9), %v1920_v5 }
  0x5c   : > { %1436 = vmatmul.mubr.msk.f32.vlgmr.msra.gmra.mrb[0].mxu0 (!%p1435_p9), %vm388_vm0, %v386_v3  ;;  %1437 = vmatmul.mubr.msk.f32.vlgmr.msra.gmra.mrb[0].mxu1 (!%p1435_p9), %vm388_vm0, %v387_v4 }
 0x12f   : > { %v461_v6 = vpop.f32.mrb[0].mxu0  ;;  %v467_v7 = vpop.f32.mrb[0].mxu1 }
 0x130   : > { %472 = vst [vmem:[#allocation2] sm:$0xff] %v461_v6  ;;  %474 = vst [vmem:[#allocation2 + $0x10] sm:$0xff] %v467_v7  ;;  %v463_v8 = vpop.f32.mrb[1].mxu0  ;;  %v469_v9 = vpop.f32.mrb[1].mxu1 }
 0x131   : > { %473 = vst [vmem:[#allocation2 + $0x8] sm:$0xff] %v463_v8  ;;  %475 = vst [vmem:[#allocation2 + $0x18] sm:$0xff] %v469_v9 }
 0x132 PF: > { %1475 = vmatprep.subr.mxu1 %v381_v2  ;;  %v478_v10 = vld [vmem:[%s2638_s3] sm:$0xff]  ;;  %vm492_vm1 = vcmask 64512   ;;  %v479_v11 = vld [vmem:[%s2638_s3 + $0x8] sm:$0xff]  ;;  %v1921_v13 = vmov 0   ;;  %v1922_v20 = vmov 0.0   ;;  %vm690_vm2 = vcmask 130048  }
 0x133   : > { %v480_v12 = vld [vmem:[%s2639_s4] sm:$0xff]  ;;  %1476 = vmatpush3.msra.mxu1 %v381_v2  ;;  %1477 = vmatprep.mubr.msk.f32.mxu1 %vm492_vm1, %v478_v10  ;;  %v481_v14 = vld [vmem:[%s2639_s4 + $0x8] sm:$0xff]  ;;  %vm1923_vm3 = vmmov 0   ;;  %s1469_s20 = sshll.u32 %s1901_s11, 5  ;;  %s1463_s13 = sshll.u32 %s1905_s12, 7 }
 0x134   : > { %1478 = vmatmul.mubr.msk.f32.vlgmr.msra.gmra.mrb[0].mxu1 %vm492_vm1, %v479_v11  ;;  %1636 = vset.pattern.permute.xlu0 %v1921_v13  ;;  %v574_v3 = vld [vmem:[%s2640_s5] sm:$0xff]  ;;  %s1282_s26 = sadd.s32 %s1469_s20, %s1463_s13  ;;  %s1285_s14 = sshll.u32 %s2166_s9, 4  ;;  %s2532_s14 = int_to_ptr.vmem [resolvable:$true] %s1285_s14 }
 0x135   : > { %484 = vperm.xlu0 %1636, %v480_v12   ;;  %803 = vmatprep.mubr.f32.mxu0 %v1922_v20  ;;  %s1464_s30 = sshll.u32 %s1282_s26, 7  ;;  %s2681_s23 = sld [smem:[#allocation23_spill]] }
 0x136   : > { %1480 = vmatprep.subr.mxu1 %v1922_v20  ;;  %1482 = vmatprep.mubr.msk.f32.mxu1 %vm1923_vm3, %v1922_v20  ;;  %s2536_s10 = scalar_lea.sflag [#allocation8], %s367_s8  ;;  %s1763_s21 = scalar_lea.vmem %s2532_s14, 4096 }
 0x137   : > { %v686_v17 = vld [vmem:[#allocation2] sm:$0xff]  ;;  %v688_v19 = vld [vmem:[#allocation2 + $0x10] sm:$0xff]  ;;  %1481 = vmatpush3.msra.mxu1 %v381_v2  ;;  %p1764_p6 = scmp.ne.s32.totalorder %s2532_s14, %s1763_s21  ;;  %p2682_p13 = scmp.ne.s32.totalorder %s2675_s19, 0 }
 0x138   : > { %v687_v15 = vld [vmem:[#allocation2 + $0x8] sm:$0xff]  ;;  %v689_v16 = vld [vmem:[#allocation2 + $0x18] sm:$0xff]  ;;  %v1487_v21 = vpack.c.bf16 %v688_v19, %v686_v17  ;;  %1483 = vmatmul.mubr.msk.f32.vlgmr.msra.gmra.mrb[2].mxu1 %vm492_vm1, %v574_v3  ;;  %s1924_s11 = smov [#allocation7]  }
 0x139   : > { %489 = vperm.xlu0 %1636, %v481_v14   ;;  %v1485_v18 = vpack.c.bf16 %v689_v16, %v687_v15  ;;  %1238 = vmatprep.mubr.f32.mxu1 %v1922_v20  ;;  %p1765_p1 = pnand %p1764_p6, %p2682_p13 }
 0x13b   : > { %1486 = vmatprep.subr.bf16.mxu0 %v1485_v18  ;;  %s2530_s0 = scalar_lea.hbm %s2681_s23, %s1464_s30  ;;  %p1766_p12 = pneg %p1765_p1 }
 0x13c   : > { %1488 = vmatpush1.bf16.msra.mxu0 %v1487_v21 }
 0x1b4   : > { %v485_v22 = vpop.permute.xlu0 %484 }
 0x1b8   : > { %v490_v26 = vpop.permute.xlu0 %489 }
 0x207   : > { %v1479_v23 = vpop.f32.mrb[0].mxu1 }
 0x208   : > { %v565_v24 = vpop.f32.mrb[1].mxu1  ;;  %v571_v27 = vadd.f32 %v1479_v23, %v490_v26 }
 0x209   : > { %v566_v25 = vadd.f32 %v565_v24, %v485_v22 }
 0x20b   : > { %654 = vxpose.xlu1.b32.start [1/2] (short) %v566_v25, 128 }
 0x20f   : > { %655 = vxpose.xlu1.b32.end [2/2] (short) %v571_v27, 128 }
 0x28b   : > { %v670_v28 = vpop.trf.xlu1 }
 0x28c   : > { %1441 = vmatmul.mubr.msk.f32.vlgmr.msra.gmra.mrb[0].mxu0 %vm690_vm2, %v670_v28 }
 0x28d   : > { %809 = vmatprep.mubr.f32.mxu0 %v1922_v20 }
 0x28f   : > { %v671_v29 = vpop.trf.xlu1 }
 0x290   : > { %1442 = vmatmul.mubr.msk.f32.gmra.mrb[2].mxu0 %vm690_vm2, %v671_v29 }
 0x291   : > { %815 = vmatprep.mubr.f32.mxu0 %v1922_v20 }
 0x293   : > { %v672_v30 = vpop.trf.xlu1 }
 0x294   : > { %1443 = vmatmul.mubr.msk.f32.gmra.mrb[4].mxu0 %vm690_vm2, %v672_v30 }
 0x295   : > { %821 = vmatprep.mubr.f32.mxu0 %v1922_v20 }
 0x297   : > { %v673_v31 = vpop.trf.xlu1 }
 0x298   : > { %1444 = vmatmul.mubr.msk.f32.gmra.mrb[6].mxu0 %vm690_vm2, %v673_v31 }
 0x299   : > { %827 = vmatprep.mubr.f32.mxu0 %v1922_v20 }
 0x29b   : > { %v674_v32 = vpop.trf.xlu1 }
 0x29c   : > { %1445 = vmatmul.mubr.msk.f32.gmra.mrb[8].mxu0 %vm690_vm2, %v674_v32 }
 0x29d   : > { %833 = vmatprep.mubr.f32.mxu0 %v1922_v20 }
 0x29f   : > { %v675_v33 = vpop.trf.xlu1 }
 0x2a0   : > { %1446 = vmatmul.mubr.msk.f32.gmra.mrb[10].mxu0 %vm690_vm2, %v675_v33 }
 0x2a1   : > { %839 = vmatprep.mubr.f32.mxu0 %v1922_v20 }
 0x2a3   : > { %v676_v34 = vpop.trf.xlu1 }
 0x2a4   : > { %1447 = vmatmul.mubr.msk.f32.gmra.mrb[12].mxu0 %vm690_vm2, %v676_v34 }
 0x2a5   : > { %845 = vmatprep.mubr.f32.mxu0 %v1922_v20 }
 0x2a7   : > { %v677_v35 = vpop.trf.xlu1 }
 0x2a8   : > { %1448 = vmatmul.mubr.msk.f32.gmra.mrb[14].mxu0 %vm690_vm2, %v677_v35 }
 0x2a9   : > { %851 = vmatprep.mubr.f32.mxu0 %v1922_v20 }
 0x2ab   : > { %v678_v36 = vpop.trf.xlu1 }
 0x2ac   : > { %1449 = vmatmul.mubr.msk.f32.gmra.mrb[16].mxu0 %vm690_vm2, %v678_v36 }
 0x2ad   : > { %857 = vmatprep.mubr.f32.mxu0 %v1922_v20 }
 0x2af   : > { %v679_v37 = vpop.trf.xlu1 }
 0x2b0   : > { %1450 = vmatmul.mubr.msk.f32.gmra.mrb[18].mxu0 %vm690_vm2, %v679_v37 }
 0x2b1   : > { %863 = vmatprep.mubr.f32.mxu0 %v1922_v20 }
 0x2b3   : > { %v680_v38 = vpop.trf.xlu1 }
 0x2b4   : > { %1451 = vmatmul.mubr.msk.f32.gmra.mrb[20].mxu0 %vm690_vm2, %v680_v38 }
 0x2b5   : > { %869 = vmatprep.mubr.f32.mxu0 %v1922_v20 }
 0x2b7   : > { %v681_v39 = vpop.trf.xlu1 }
 0x2b8   : > { %1452 = vmatmul.mubr.msk.f32.gmra.mrb[22].mxu0 %vm690_vm2, %v681_v39 }
 0x2b9   : > { %875 = vmatprep.mubr.f32.mxu0 %v1922_v20 }
 0x2bb   : > { %v682_v40 = vpop.trf.xlu1 }
 0x2bc   : > { %1453 = vmatmul.mubr.msk.f32.gmra.mrb[24].mxu0 %vm690_vm2, %v682_v40 }
 0x2bd   : > { %881 = vmatprep.mubr.f32.mxu0 %v1922_v20 }
 0x2bf   : > { %v683_v41 = vpop.trf.xlu1 }
 0x2c0   : > { %1454 = vmatmul.mubr.msk.f32.gmra.mrb[26].mxu0 %vm690_vm2, %v683_v41 }
 0x2c1   : > { %887 = vmatprep.mubr.f32.mxu0 %v1922_v20 }
 0x2c3   : > { %v684_v42 = vpop.trf.xlu1 }
 0x2c4   : > { %1455 = vmatmul.mubr.msk.f32.gmra.mrb[28].mxu0 %vm690_vm2, %v684_v42 }
 0x2c5   : > { %893 = vmatprep.mubr.f32.mxu0 %v1922_v20 }
 0x2c7   : > { %v685_v43 = vpop.trf.xlu1 }
 0x2c8   : > { %1456 = vmatmul.mubr.msk.f32.gmra.mrb[30].mxu0 %vm690_vm2, %v685_v43 }
 0x35f   : > { %v2224_v44 = vpop.f32.mrb[0].mxu0 }
 0x360   : > { %v2226_v45 = vpop.f32.mrb[1].mxu0 }
 0x361   : > { %v900_v46 = vmax.f32 %v2224_v44, %v2226_v45 }
 0x363   : > { %901 = vmax.xlane.f32.xlu0 %v900_v46  ;;  %v2230_v47 = vpop.f32.mrb[2].mxu0 }
 0x364   : > { %v2232_v48 = vpop.f32.mrb[3].mxu0 }
 0x365   : > { %v903_v49 = vmax.f32 %v2230_v47, %v2232_v48 }
 0x367   : > { %904 = vmax.xlane.f32.xlu1 %v903_v49  ;;  %v2236_v50 = vpop.f32.mrb[4].mxu0 }
 0x368   : > { %v2238_v51 = vpop.f32.mrb[5].mxu0 }
 0x369   : > { %v906_v52 = vmax.f32 %v2236_v50, %v2238_v51 }
 0x36b   : > { %907 = vmax.xlane.f32.xlu0 %v906_v52  ;;  %v2242_v53 = vpop.f32.mrb[6].mxu0 }
 0x36c   : > { %v2244_v54 = vpop.f32.mrb[7].mxu0 }
 0x36d   : > { %v909_v55 = vmax.f32 %v2242_v53, %v2244_v54 }
 0x36f   : > { %910 = vmax.xlane.f32.xlu0 %v909_v55  ;;  %v2248_v56 = vpop.f32.mrb[8].mxu0 }
 0x370   : > { %v2250_v57 = vpop.f32.mrb[9].mxu0 }
 0x371   : > { %v912_v58 = vmax.f32 %v2248_v56, %v2250_v57 }
 0x373   : > { %913 = vmax.xlane.f32.xlu0 %v912_v58  ;;  %v2254_v59 = vpop.f32.mrb[10].mxu0 }
 0x374   : > { %v2256_v60 = vpop.f32.mrb[11].mxu0 }
 0x375   : > { %v915_v61 = vmax.f32 %v2254_v59, %v2256_v60 }
 0x377   : > { %916 = vmax.xlane.f32.xlu0 %v915_v61  ;;  %v2260_v62 = vpop.f32.mrb[12].mxu0 }
 0x378   : > { %v2262_v63 = vpop.f32.mrb[13].mxu0 }
 0x379   : > { %v918_v0 = vmax.f32 %v2260_v62, %v2262_v63 }
 0x37b   : > { %919 = vmax.xlane.f32.xlu0 %v918_v0  ;;  %v2266_v1 = vpop.f32.mrb[14].mxu0 }
 0x37c   : > { %v2268_v2 = vpop.f32.mrb[15].mxu0 }
 0x37d   : > { %v921_v4 = vmax.f32 %v2266_v1, %v2268_v2 }
 0x37f   : > { %922 = vmax.xlane.f32.xlu0 %v921_v4  ;;  %v2278_v5 = vpop.f32.mrb[16].mxu0 }
 0x380   : > { %v2280_v6 = vpop.f32.mrb[17].mxu0 }
 0x381   : > { %v924_v7 = vmax.f32 %v2278_v5, %v2280_v6 }
 0x383   : > { %925 = vmax.xlane.f32.xlu0 %v924_v7  ;;  %v2284_v8 = vpop.f32.mrb[18].mxu0 }
 0x384   : > { %v2286_v9 = vpop.f32.mrb[19].mxu0 }
 0x385   : > { %v927_v10 = vmax.f32 %v2284_v8, %v2286_v9 }
 0x387   : > { %928 = vmax.xlane.f32.xlu0 %v927_v10  ;;  %v2290_v11 = vpop.f32.mrb[20].mxu0 }
 0x388   : > { %v2292_v12 = vpop.f32.mrb[21].mxu0 }
 0x389   : > { %v930_v13 = vmax.f32 %v2290_v11, %v2292_v12 }
 0x38b   : > { %931 = vmax.xlane.f32.xlu0 %v930_v13  ;;  %v2296_v14 = vpop.f32.mrb[22].mxu0 }
 0x38c   : > { %v2298_v15 = vpop.f32.mrb[23].mxu0 }
 0x38d   : > { %v933_v16 = vmax.f32 %v2296_v14, %v2298_v15 }
 0x38f   : > { %934 = vmax.xlane.f32.xlu0 %v933_v16  ;;  %v2302_v17 = vpop.f32.mrb[24].mxu0 }
 0x390   : > { %v2304_v18 = vpop.f32.mrb[25].mxu0 }
 0x391   : > { %v936_v19 = vmax.f32 %v2302_v17, %v2304_v18 }
 0x393   : > { %937 = vmax.xlane.f32.xlu0 %v936_v19  ;;  %v2308_v20 = vpop.f32.mrb[26].mxu0 }
 0x394   : > { %v2310_v21 = vpop.f32.mrb[27].mxu0 }
 0x395   : > { %v939_v22 = vmax.f32 %v2308_v20, %v2310_v21 }
 0x397   : > { %940 = vmax.xlane.f32.xlu0 %v939_v22  ;;  %v2314_v23 = vpop.f32.mrb[28].mxu0 }
 0x398   : > { %v2316_v24 = vpop.f32.mrb[29].mxu0 }
 0x399   : > { %v942_v25 = vmax.f32 %v2314_v23, %v2316_v24 }
 0x39b   : > { %943 = vmax.xlane.f32.xlu0 %v942_v25  ;;  %v2320_v26 = vpop.f32.mrb[30].mxu0 }
 0x39c   : > { %v2322_v27 = vpop.f32.mrb[31].mxu0 }
 0x39d   : > { %v945_v28 = vmax.f32 %v2320_v26, %v2322_v27 }
 0x39f   : > { %946 = vmax.xlane.f32.xlu0 %v945_v28 }
 0x3f0   : > { %v902_v29 = vpop.xlane.xlu0 %901 }
 0x3f1   : > { %v948_v30 = vsub.f32 %v2224_v44, %v902_v29  ;;  %v949_v31 = vsub.f32 %v2226_v45, %v902_v29 }
 0x3f3   : > { %v980_v32 = vmul.f32 1.442695, %v948_v30  ;;  %v982_v33 = vmul.f32 1.442695, %v949_v31 }
 0x3f4   : > { %v905_v34 = vpop.xlane.xlu1 %904 }
 0x3f5   : > { %1637 = vpow2.f32 %v980_v32  ;;  %v950_v35 = vsub.f32 %v2230_v47, %v905_v34  ;;  %v951_v36 = vsub.f32 %v2232_v48, %v905_v34 }
 0x3f6   : > { %1639 = vpow2.f32 %v982_v33 }
 0x3f7   : > { %v984_v37 = vmul.f32 1.442695, %v950_v35  ;;  %v986_v38 = vmul.f32 1.442695, %v951_v36 }
 0x3f8   : > { %v908_v39 = vpop.xlane.xlu0 %907 }
 0x3f9   : > { %1641 = vpow2.f32 %v984_v37  ;;  %v952_v40 = vsub.f32 %v2236_v50, %v908_v39  ;;  %v953_v41 = vsub.f32 %v2238_v51, %v908_v39 }
 0x3fa   : > { %1643 = vpow2.f32 %v986_v38 }
 0x3fb   : > { %v988_v42 = vmul.f32 1.442695, %v952_v40  ;;  %v990_v43 = vmul.f32 1.442695, %v953_v41 }
 0x3fc   : > { %v911_v44 = vpop.xlane.xlu0 %910 }
 0x3fd   : > { %1645 = vpow2.f32 %v988_v42  ;;  %v954_v45 = vsub.f32 %v2242_v53, %v911_v44  ;;  %v955_v46 = vsub.f32 %v2244_v54, %v911_v44 }
 0x3fe   : > { %1647 = vpow2.f32 %v990_v43 }
 0x3ff   : > { %v2334_v47 = vpop.eup %1637  ;;  %v992_v48 = vmul.f32 1.442695, %v954_v45  ;;  %v994_v49 = vmul.f32 1.442695, %v955_v46 }
 0x400   : > { %v2336_v52 = vpop.eup %1639  ;;  %v914_v55 = vpop.xlane.xlu0 %913 }
 0x401   : > { %1649 = vpow2.f32 %v992_v48  ;;  %v956_v50 = vsub.f32 %v2248_v56, %v914_v55  ;;  %v957_v51 = vsub.f32 %v2250_v57, %v914_v55  ;;  %v1044_v58 = vadd.f32 %v2336_v52, %v2334_v47 }
 0x402   : > { %1651 = vpow2.f32 %v994_v49 }
 0x403   : > { %v2342_v53 = vpop.eup %1641  ;;  %v996_v54 = vmul.f32 1.442695, %v956_v50  ;;  %v998_v61 = vmul.f32 1.442695, %v957_v51  ;;  %1045 = vadd.xlane.f32.xlu0 %v1044_v58 }
 0x404   : > { %v2344_v0 = vpop.eup %1643  ;;  %v917_v3 = vpop.xlane.xlu0 %916 }
 0x405   : > { %1653 = vpow2.f32 %v996_v54  ;;  %v958_v4 = vsub.f32 %v2254_v59, %v917_v3  ;;  %v959_v7 = vsub.f32 %v2256_v60, %v917_v3  ;;  %v1047_v56 = vadd.f32 %v2344_v0, %v2342_v53 }
 0x406   : > { %1655 = vpow2.f32 %v998_v61 }
 0x407   : > { %v2350_v57 = vpop.eup %1645  ;;  %v1000_v10 = vmul.f32 1.442695, %v958_v4  ;;  %v1002_v13 = vmul.f32 1.442695, %v959_v7  ;;  %1048 = vadd.xlane.f32.xlu0 %v1047_v56 }
 0x408   : > { %v2352_v16 = vpop.eup %1647  ;;  %v920_v19 = vpop.xlane.xlu0 %919 }
 0x409   : > { %1657 = vpow2.f32 %v1000_v10  ;;  %v960_v22 = vsub.f32 %v2260_v62, %v920_v19  ;;  %v961_v25 = vsub.f32 %v2262_v63, %v920_v19  ;;  %v1050_v59 = vadd.f32 %v2352_v16, %v2350_v57 }
 0x40a   : > { %1659 = vpow2.f32 %v1002_v13 }
 0x40b   : > { %v2358_v60 = vpop.eup %1649  ;;  %v1004_v28 = vmul.f32 1.442695, %v960_v22  ;;  %v1006_v29 = vmul.f32 1.442695, %v961_v25  ;;  %1051 = vadd.xlane.f32.xlu0 %v1050_v59 }
 0x40c   : > { %v2360_v30 = vpop.eup %1651  ;;  %v923_v31 = vpop.xlane.xlu0 %922 }
 0x40d   : > { %1661 = vpow2.f32 %v1004_v28  ;;  %v962_v32 = vsub.f32 %v2266_v1, %v923_v31  ;;  %v963_v33 = vsub.f32 %v2268_v2, %v923_v31  ;;  %v1053_v62 = vadd.f32 %v2360_v30, %v2358_v60 }
 0x40e   : > { %1663 = vpow2.f32 %v1006_v29 }
 0x40f   : > { %v2366_v63 = vpop.eup %1653  ;;  %v1008_v34 = vmul.f32 1.442695, %v962_v32  ;;  %v1010_v35 = vmul.f32 1.442695, %v963_v33  ;;  %1054 = vadd.xlane.f32.xlu1 %v1053_v62 }
 0x410   : > { %v2368_v36 = vpop.eup %1655  ;;  %v926_v37 = vpop.xlane.xlu0 %925 }
 0x411   : > { %1665 = vpow2.f32 %v1008_v34  ;;  %v964_v38 = vsub.f32 %v2278_v5, %v926_v37  ;;  %v965_v39 = vsub.f32 %v2280_v6, %v926_v37  ;;  %v1056_v1 = vadd.f32 %v2368_v36, %v2366_v63 }
 0x412   : > { %1667 = vpow2.f32 %v1010_v35 }
 0x413   : > { %v2374_v2 = vpop.eup %1657  ;;  %v1012_v40 = vmul.f32 1.442695, %v964_v38  ;;  %v1014_v41 = vmul.f32 1.442695, %v965_v39  ;;  %1057 = vadd.xlane.f32.xlu0 %v1056_v1 }
 0x414   : > { %v2376_v42 = vpop.eup %1659  ;;  %v929_v43 = vpop.xlane.xlu0 %928 }
 0x415   : > { %1669 = vpow2.f32 %v1012_v40  ;;  %v966_v44 = vsub.f32 %v2284_v8, %v929_v43  ;;  %v967_v45 = vsub.f32 %v2286_v9, %v929_v43  ;;  %v1059_v5 = vadd.f32 %v2376_v42, %v2374_v2 }
 0x416   : > { %1671 = vpow2.f32 %v1014_v41 }
 0x417   : > { %v2382_v6 = vpop.eup %1661  ;;  %v1016_v46 = vmul.f32 1.442695, %v966_v44  ;;  %v1018_v48 = vmul.f32 1.442695, %v967_v45  ;;  %1060 = vadd.xlane.f32.xlu1 %v1059_v5 }
 0x418   : > { %v2384_v49 = vpop.eup %1663  ;;  %v932_v55 = vpop.xlane.xlu0 %931 }
 0x419   : > { %1673 = vpow2.f32 %v1016_v46  ;;  %v968_v50 = vsub.f32 %v2290_v11, %v932_v55  ;;  %v969_v51 = vsub.f32 %v2292_v12, %v932_v55  ;;  %v1062_v8 = vadd.f32 %v2384_v49, %v2382_v6 }
 0x41a   : > { %1675 = vpow2.f32 %v1018_v48 }
 0x41b   : > { %v2390_v9 = vpop.eup %1665  ;;  %v1020_v58 = vmul.f32 1.442695, %v968_v50  ;;  %v1022_v54 = vmul.f32 1.442695, %v969_v51  ;;  %1063 = vadd.xlane.f32.xlu0 %v1062_v8 }
 0x41c   : > { %v2392_v61 = vpop.eup %1667  ;;  %v935_v3 = vpop.xlane.xlu0 %934 }
 0x41d   : > { %1677 = vpow2.f32 %v1020_v58  ;;  %v970_v4 = vsub.f32 %v2296_v14, %v935_v3  ;;  %v971_v7 = vsub.f32 %v2298_v15, %v935_v3  ;;  %v1065_v11 = vadd.f32 %v2392_v61, %v2390_v9 }
 0x41e   : > { %1679 = vpow2.f32 %v1022_v54 }
 0x41f   : > { %v2398_v12 = vpop.eup %1669  ;;  %v1024_v56 = vmul.f32 1.442695, %v970_v4  ;;  %v1026_v10 = vmul.f32 1.442695, %v971_v7  ;;  %1066 = vadd.xlane.f32.xlu1 %v1065_v11  ;;  %v575_v7 = vld [vmem:[%s2641_s6] sm:$0xff]  ;;  %v2457_v11 = vpop.f32.mrb[2].mxu1 }
 0x420   : > { %v2400_v13 = vpop.eup %1671  ;;  %v938_v19 = vpop.xlane.xlu0 %937 }
 0x421   : > { %1681 = vpow2.f32 %v1024_v56  ;;  %v972_v22 = vsub.f32 %v2302_v17, %v938_v19  ;;  %v973_v25 = vsub.f32 %v2304_v18, %v938_v19  ;;  %v1068_v14 = vadd.f32 %v2400_v13, %v2398_v12  ;;  %v1484_v56 = vpop.f32.mrb[3].mxu1 }
 0x422   : > { %1683 = vpow2.f32 %v1026_v10 }
 0x423   : > { %v2406_v15 = vpop.eup %1673  ;;  %v1028_v59 = vmul.f32 1.442695, %v972_v22  ;;  %v1030_v28 = vmul.f32 1.442695, %v973_v25  ;;  %1069 = vadd.xlane.f32.xlu0 %v1068_v14 }
 0x424   : > { %v2408_v29 = vpop.eup %1675  ;;  %v941_v31 = vpop.xlane.xlu0 %940 }
 0x425   : > { %1685 = vpow2.f32 %v1028_v59  ;;  %v974_v32 = vsub.f32 %v2308_v20, %v941_v31  ;;  %v975_v33 = vsub.f32 %v2310_v21, %v941_v31  ;;  %v1071_v17 = vadd.f32 %v2408_v29, %v2406_v15 }
 0x426   : > { %1687 = vpow2.f32 %v1030_v28 }
 0x427   : > { %v2414_v18 = vpop.eup %1677  ;;  %v1032_v62 = vmul.f32 1.442695, %v974_v32  ;;  %v1034_v34 = vmul.f32 1.442695, %v975_v33  ;;  %1072 = vadd.xlane.f32.xlu1 %v1071_v17 }
 0x428   : > { %v2416_v35 = vpop.eup %1679  ;;  %v944_v37 = vpop.xlane.xlu0 %943 }
 0x429   : > { %1689 = vpow2.f32 %v1032_v62  ;;  %v976_v38 = vsub.f32 %v2314_v23, %v944_v37  ;;  %v977_v39 = vsub.f32 %v2316_v24, %v944_v37  ;;  %v1074_v20 = vadd.f32 %v2416_v35, %v2414_v18 }
 0x42a   : > { %1691 = vpow2.f32 %v1034_v34 }
 0x42b   : > { %v2422_v21 = vpop.eup %1681  ;;  %v1036_v1 = vmul.f32 1.442695, %v976_v38  ;;  %v1038_v40 = vmul.f32 1.442695, %v977_v39  ;;  %1075 = vadd.xlane.f32.xlu0 %v1074_v20 }
 0x42c   : > { %v2424_v41 = vpop.eup %1683  ;;  %v947_v43 = vpop.xlane.xlu0 %946 }
 0x42d   : > { %1693 = vpow2.f32 %v1036_v1  ;;  %v978_v44 = vsub.f32 %v2320_v26, %v947_v43  ;;  %v979_v45 = vsub.f32 %v2322_v27, %v947_v43  ;;  %v1077_v23 = vadd.f32 %v2424_v41, %v2422_v21 }
 0x42e   : > { %1695 = vpow2.f32 %v1038_v40 }
 0x42f   : > { %v2430_v24 = vpop.eup %1685  ;;  %v1040_v5 = vmul.f32 1.442695, %v978_v44  ;;  %v1042_v46 = vmul.f32 1.442695, %v979_v45  ;;  %1078 = vadd.xlane.f32.xlu1 %v1077_v23 }
 0x430   : > { %v2432_v48 = vpop.eup %1687 }
 0x431   : > { %1697 = vpow2.f32 %v1040_v5  ;;  %v1080_v55 = vadd.f32 %v2432_v48, %v2430_v24 }
 0x432   : > { %1699 = vpow2.f32 %v1042_v46 }
 0x433   : > { %v2436_v50 = vpop.eup %1689  ;;  %1081 = vadd.xlane.f32.xlu0 %v1080_v55 }
 0x434   : > { %v2438_v26 = vpop.eup %1691 }
 0x435   : > { %v1083_v27 = vadd.f32 %v2438_v26, %v2436_v50 }
 0x437   : > { %v2442_v51 = vpop.eup %1693  ;;  %1084 = vadd.xlane.f32.xlu1 %v1083_v27 }
 0x438   : > { %v2444_v8 = vpop.eup %1695 }
 0x439   : > { %v1086_v58 = vadd.f32 %v2444_v8, %v2442_v51 }
 0x43b   : > { %v2448_v54 = vpop.eup %1697  ;;  %1087 = vadd.xlane.f32.xlu0 %v1086_v58 }
 0x43c   : > { %v2450_v3 = vpop.eup %1699 }
 0x43d   : > { %v1089_v4 = vadd.f32 %v2450_v3, %v2448_v54 }
 0x43f   : > { %1090 = vadd.xlane.f32.xlu1 %v1089_v4 }
 0x451   : > { %578 = vperm.xlu0 %1636, %v575_v7  }
 0x490   : > { %v1046_v10 = vpop.xlane.xlu0 %1045 }
 0x491   : > { %1701 = vrcp.f32 %v1046_v10 }
 0x494   : > { %v1049_v19 = vpop.xlane.xlu0 %1048 }
 0x495   : > { %1703 = vrcp.f32 %v1049_v19 }
 0x498   : > { %v1052_v22 = vpop.xlane.xlu0 %1051 }
 0x499   : > { %1705 = vrcp.f32 %v1052_v22 }
 0x49b   : > { %v1702_v25 = vpop.eup %1701 }
 0x49c   : > { %v1055_v14 = vpop.xlane.xlu1 %1054  ;;  %v1109_v59 = vmul.f32 %v1702_v25, %v2336_v52  ;;  %v1108_v28 = vmul.f32 %v1702_v25, %v2334_v47 }
 0x49d   : > { %1707 = vrcp.f32 %v1055_v14 }
 0x49e   : > { %1141 = vst [vmem:[%s2166_s9 + $0x8] sm:$0xff] %v1109_v59  ;;  %1140 = vst [vmem:[%s2166_s9] sm:$0xff] %v1108_v28 }
 0x49f   : > { %v1704_v31 = vpop.eup %1703 }
 0x4a0   : > { %v1058_v32 = vpop.xlane.xlu0 %1057  ;;  %v1111_v33 = vmul.f32 %v1704_v31, %v2344_v0  ;;  %v1110_v17 = vmul.f32 %v1704_v31, %v2342_v53 }
 0x4a1   : > { %1709 = vrcp.f32 %v1058_v32 }
 0x4a2   : > { %1143 = vst [vmem:[%s2166_s9 + $0x18] sm:$0xff] %v1111_v33  ;;  %v1489_v62 = vpack.c.bf16 %v1111_v33, %v1109_v59  ;;  %1142 = vst [vmem:[%s2166_s9 + $0x10] sm:$0xff] %v1110_v17  ;;  %v1491_v34 = vpack.c.bf16 %v1110_v17, %v1108_v28 }
 0x4a3   : > { %v1706_v52 = vpop.eup %1705 }
 0x4a4   : > { %1490 = vmatprep.subr.bf16.mxu1 %v1489_v62  ;;  %v1061_v47 = vpop.xlane.xlu1 %1060  ;;  %v1113_v37 = vmul.f32 %v1706_v52, %v2352_v16  ;;  %v1112_v38 = vmul.f32 %v1706_v52, %v2350_v57 }
 0x4a5   : > { %1711 = vrcp.f32 %v1061_v47  ;;  %1492 = vmatpush1.bf16.msra.mxu1 %v1491_v34 }
 0x4a6   : > { %1145 = vst [vmem:[%s2166_s9 + $0x28] sm:$0xff] %v1113_v37  ;;  %1144 = vst [vmem:[%s2166_s9 + $0x20] sm:$0xff] %v1112_v38 }
 0x4a7   : > { %v1708_v0 = vpop.eup %1707 }
 0x4a8   : > { %v1064_v53 = vpop.xlane.xlu0 %1063  ;;  %v1115_v39 = vmul.f32 %v1708_v0, %v2360_v30  ;;  %v1114_v20 = vmul.f32 %v1708_v0, %v2358_v60 }
 0x4a9   : > { %1713 = vrcp.f32 %v1064_v53 }
 0x4aa   : > { %1147 = vst [vmem:[%s2166_s9 + $0x38] sm:$0xff] %v1115_v39  ;;  %v1493_v1 = vpack.c.bf16 %v1115_v39, %v1113_v37  ;;  %1146 = vst [vmem:[%s2166_s9 + $0x30] sm:$0xff] %v1114_v20  ;;  %v1495_v16 = vpack.c.bf16 %v1114_v20, %v1112_v38 }
 0x4ab   : > { %v1710_v40 = vpop.eup %1709 }
 0x4ac   : > { %1494 = vmatprep.subr.bf16.mxu1 %v1493_v1  ;;  %v1067_v57 = vpop.xlane.xlu1 %1066  ;;  %v1117_v43 = vmul.f32 %v1710_v40, %v2368_v36  ;;  %v1116_v44 = vmul.f32 %v1710_v40, %v2366_v63 }
 0x4ad   : > { %1715 = vrcp.f32 %v1067_v57  ;;  %1496 = vmatpush1.bf16.msra.mxu1 %v1495_v16 }
 0x4ae   : > { %1149 = vst [vmem:[%s2166_s9 + $0x48] sm:$0xff] %v1117_v43  ;;  %1148 = vst [vmem:[%s2166_s9 + $0x40] sm:$0xff] %v1116_v44 }
 0x4af   : > { %v1712_v30 = vpop.eup %1711 }
 0x4b0   : > { %v1070_v60 = vpop.xlane.xlu0 %1069  ;;  %v1119_v45 = vmul.f32 %v1712_v30, %v2376_v42  ;;  %v1118_v23 = vmul.f32 %v1712_v30, %v2374_v2 }
 0x4b1   : > { %1717 = vrcp.f32 %v1070_v60 }
 0x4b2   : > { %1151 = vst [vmem:[%s2166_s9 + $0x58] sm:$0xff] %v1119_v45  ;;  %v1497_v5 = vpack.c.bf16 %v1119_v45, %v1117_v43  ;;  %1150 = vst [vmem:[%s2166_s9 + $0x50] sm:$0xff] %v1118_v23  ;;  %v1499_v36 = vpack.c.bf16 %v1118_v23, %v1116_v44 }
 0x4b3   : > { %v1714_v46 = vpop.eup %1713 }
 0x4b4   : > { %1498 = vmatprep.subr.bf16.mxu1 %v1497_v5  ;;  %v1073_v63 = vpop.xlane.xlu1 %1072  ;;  %v1121_v55 = vmul.f32 %v1714_v46, %v2384_v49  ;;  %v1120_v27 = vmul.f32 %v1714_v46, %v2382_v6 }
 0x4b5   : > { %1719 = vrcp.f32 %v1073_v63  ;;  %1500 = vmatpush1.bf16.msra.mxu1 %v1499_v36 }
 0x4b6   : > { %1153 = vst [vmem:[%s2166_s9 + $0x68] sm:$0xff] %v1121_v55  ;;  %1152 = vst [vmem:[%s2166_s9 + $0x60] sm:$0xff] %v1120_v27 }
 0x4b7   : > { %v1716_v42 = vpop.eup %1715 }
 0x4b8   : > { %v1076_v2 = vpop.xlane.xlu0 %1075  ;;  %v1123_v58 = vmul.f32 %v1716_v42, %v2392_v61  ;;  %v1122_v4 = vmul.f32 %v1716_v42, %v2390_v9 }
 0x4b9   : > { %1721 = vrcp.f32 %v1076_v2 }
 0x4ba   : > { %1155 = vst [vmem:[%s2166_s9 + $0x78] sm:$0xff] %v1123_v58  ;;  %v1501_v7 = vpack.c.bf16 %v1123_v58, %v1121_v55  ;;  %1154 = vst [vmem:[%s2166_s9 + $0x70] sm:$0xff] %v1122_v4  ;;  %v1503_v49 = vpack.c.bf16 %v1122_v4, %v1120_v27 }
 0x4bb   : > { %v1718_v56 = vpop.eup %1717 }
 0x4bc   : > { %1502 = vmatprep.subr.bf16.mxu1 %v1501_v7  ;;  %v1079_v6 = vpop.xlane.xlu1 %1078  ;;  %v1125_v10 = vmul.f32 %v1718_v56, %v2400_v13  ;;  %v1124_v19 = vmul.f32 %v1718_v56, %v2398_v12 }
 0x4bd   : > { %1723 = vrcp.f32 %v1079_v6  ;;  %1504 = vmatpush1.bf16.msra.mxu1 %v1503_v49 }
 0x4be   : > { %1157 = vst [vmem:[%s2166_s9 + $0x88] sm:$0xff] %v1125_v10  ;;  %1156 = vst [vmem:[%s2166_s9 + $0x80] sm:$0xff] %v1124_v19 }
 0x4bf   : > { %v1720_v61 = vpop.eup %1719 }
 0x4c0   : > { %v1082_v9 = vpop.xlane.xlu0 %1081  ;;  %v1127_v22 = vmul.f32 %v1720_v61, %v2408_v29  ;;  %v1126_v25 = vmul.f32 %v1720_v61, %v2406_v15 }
 0x4c1   : > { %1725 = vrcp.f32 %v1082_v9 }
 0x4c2   : > { %1159 = vst [vmem:[%s2166_s9 + $0x98] sm:$0xff] %v1127_v22  ;;  %v1505_v14 = vpack.c.bf16 %v1127_v22, %v1125_v10  ;;  %1158 = vst [vmem:[%s2166_s9 + $0x90] sm:$0xff] %v1126_v25  ;;  %v1507_v13 = vpack.c.bf16 %v1126_v25, %v1124_v19 }
 0x4c3   : > { %v1722_v59 = vpop.eup %1721 }
 0x4c4   : > { %1506 = vmatprep.subr.bf16.mxu1 %v1505_v14  ;;  %v1085_v12 = vpop.xlane.xlu1 %1084  ;;  %v1129_v28 = vmul.f32 %v1722_v59, %v2416_v35  ;;  %v1128_v31 = vmul.f32 %v1722_v59, %v2414_v18 }
 0x4c5   : > { %1727 = vrcp.f32 %v1085_v12  ;;  %1508 = vmatpush1.bf16.msra.mxu1 %v1507_v13 }
 0x4c6   : > { %1161 = vst [vmem:[%s2166_s9 + $0xa8] sm:$0xff] %v1129_v28  ;;  %1160 = vst [vmem:[%s2166_s9 + $0xa0] sm:$0xff] %v1128_v31 }
 0x4c7   : > { %v1724_v29 = vpop.eup %1723 }
 0x4c8   : > { %v1088_v15 = vpop.xlane.xlu0 %1087  ;;  %v1131_v32 = vmul.f32 %v1724_v29, %v2424_v41  ;;  %v1130_v33 = vmul.f32 %v1724_v29, %v2422_v21 }
 0x4c9   : > { %1729 = vrcp.f32 %v1088_v15 }
 0x4ca   : > { %1163 = vst [vmem:[%s2166_s9 + $0xb8] sm:$0xff] %v1131_v32  ;;  %v1509_v17 = vpack.c.bf16 %v1131_v32, %v1129_v28  ;;  %1162 = vst [vmem:[%s2166_s9 + $0xb0] sm:$0xff] %v1130_v33  ;;  %v1511_v35 = vpack.c.bf16 %v1130_v33, %v1128_v31 }
 0x4cb   : > { %v1726_v18 = vpop.eup %1725 }
 0x4cc   : > { %1510 = vmatprep.subr.bf16.mxu1 %v1509_v17  ;;  %v1091_v62 = vpop.xlane.xlu1 %1090  ;;  %v1133_v34 = vmul.f32 %v1726_v18, %v2432_v48  ;;  %v1132_v52 = vmul.f32 %v1726_v18, %v2430_v24 }
 0x4cd   : > { %1731 = vrcp.f32 %v1091_v62  ;;  %1512 = vmatpush1.bf16.msra.mxu1 %v1511_v35 }
 0x4ce   : > { %1165 = vst [vmem:[%s2166_s9 + $0xc8] sm:$0xff] %v1133_v34  ;;  %1164 = vst [vmem:[%s2166_s9 + $0xc0] sm:$0xff] %v1132_v52 }
 0x4cf   : > { %v1728_v21 = vpop.eup %1727 }
 0x4d0   : > { %v1135_v41 = vmul.f32 %v1728_v21, %v2438_v26  ;;  %v1134_v47 = vmul.f32 %v1728_v21, %v2436_v50 }
 0x4d2   : > { %1167 = vst [vmem:[%s2166_s9 + $0xd8] sm:$0xff] %v1135_v41  ;;  %v1513_v37 = vpack.c.bf16 %v1135_v41, %v1133_v34  ;;  %1166 = vst [vmem:[%s2166_s9 + $0xd0] sm:$0xff] %v1134_v47  ;;  %v1515_v38 = vpack.c.bf16 %v1134_v47, %v1132_v52 }
 0x4d3   : > { %v1730_v48 = vpop.eup %1729 }
 0x4d4   : > { %1514 = vmatprep.subr.bf16.mxu1 %v1513_v37  ;;  %v1137_v24 = vmul.f32 %v1730_v48, %v2444_v8  ;;  %v1136_v0 = vmul.f32 %v1730_v48, %v2442_v51  ;;  %v579_v8 = vpop.permute.xlu0 %578 }
 0x4d5   : > { %1516 = vmatpush1.bf16.msra.mxu1 %v1515_v38  ;;  %v651_v51 = vadd.f32 %v2457_v11, %v579_v8 }
 0x4d6   : > { %1169 = vst [vmem:[%s2166_s9 + $0xe8] sm:$0xff] %v1137_v24  ;;  %1168 = vst [vmem:[%s2166_s9 + $0xe0] sm:$0xff] %v1136_v0 }
 0x4d7   : > { %v1732_v26 = vpop.eup %1731 }
 0x4d8   : > { %v1139_v50 = vmul.f32 %v1732_v26, %v2450_v3  ;;  %v1138_v53 = vmul.f32 %v1732_v26, %v2448_v54 }
 0x4da   : > { %1171 = vst [vmem:[%s2166_s9 + $0xf8] sm:$0xff] %v1139_v50  ;;  %v1517_v39 = vpack.c.bf16 %v1139_v50, %v1137_v24  ;;  %1170 = vst [vmem:[%s2166_s9 + $0xf0] sm:$0xff] %v1138_v53  ;;  %v1519_v20 = vpack.c.bf16 %v1138_v53, %v1136_v0  ;;  %s1767_s9 = sshll.u32 %s1924_s11, 4  ;;  %s1768_s9 = int_to_ptr.vmem [resolvable:$false] %s1767_s9 }
 0x4db   : > { %s1769_s20 = scalar_lea.vmem %s1768_s9, 8192  ;;  %p1770_p0 = scmp.lt.s32.totalorder %s2532_s14, %s1768_s9 }
 0x4dc   : > { %1518 = vmatprep.subr.bf16.mxu1 %v1517_v39  ;;  %p1771_p3 = scmp.lt.s32.totalorder %s1769_s20, %s1763_s21 }
 0x4dd   : > { %1520 = vmatpush1.bf16.msra.mxu1 %v1519_v20 }
 0x4de   : > { %p1772_p5 = por %p1771_p3, %p1770_p0 }
 0x4e0   : > { %1239 = vmatmul.mubr.f32.vlgmr.msra.gmra.mrb[4].mxu1 %v651_v51  ;;  %p1773_p7 = pnand %p1772_p5, %p1766_p12 }
 0x4e2   : > { %1776 = shalt.err (!%p1773_p7)
}
 0x4e3   : > { %s1777_s8 = scalar_lea.hbm %s2530_s0, 4096  ;;  %s1781_s30 = scalar_lea.hbm %s2681_s23, 32768 }
 0x4e4   : > { %p1778_p11 = scmp.ne.s32.totalorder %s2530_s0, %s1777_s8  ;;  %p1782_p10 = scmp.lt.u32.totalorder %s2530_s0, %s2681_s23 }
 0x4e5   : > { %p1783_p2 = scmp.lt.u32.totalorder %s1781_s30, %s1777_s8  ;;  %p1785_p6 = scmp.lt.u32.totalorder %s1777_s8, %s2530_s0 }
 0x4e6   : > { %p1779_p4 = pnand %p1778_p11, %p2682_p13 }
 0x4e7   : > { %p1784_p9 = por %p1783_p2, %p1782_p10 }
 0x4e8   : > { %p1780_p8 = pneg %p1779_p4 }
 0x4e9   : > { %p1786_p1 = por %p1785_p6, %p1784_p9 }
 0x4eb   : > { %p1787_p12 = pnand %p1786_p1, %p1780_p8 }
 0x4ed   : > { %1790 = shalt.err (!%p1787_p12)
}
 0x4ee   : > { %s1925_s21 = smov 256   ;;  %s1926_s11 = smov 16   ;;  %v1172_v54 = vld [vmem:[%s2164_s7] sm:$0xff]  ;;  %v1173_v3 = vld [vmem:[%s2164_s7 + $0x8] sm:$0xff] }
 0x4ef   : > { %1526 = dma.vmem_to_hbm [thread:$0]  (%p2682_p13), %s2532_s14, 4096, %s2530_s0, %s2536_s10, %s1925_s21, %s1925_s21, %s1926_s11  }
 0x4f0   : > { %s2683_s9 = sld [smem:[#allocation19_spill]]  ;;  %s1468_s20 = sshll.u32 %s1905_s12, 8 }
 0x4f1   : > { %s1269_s8 = sshll.u32 %s2164_s7, 4  ;;  %s2684_s30 = sld [smem:[#allocation22_spill]]  ;;  %s2569_s8 = int_to_ptr.vmem [resolvable:$true] %s1269_s8 }
 0x4f2   : > { %s1250_s19 = scalar_lea.sflag [#allocation5], %s2146_s17  ;;  %s1791_s14 = scalar_lea.vmem %s2569_s8, 256 }
 0x4f3   : > { %p1792_p13 = scmp.ne.s32.totalorder %s2569_s8, %s1791_s14  ;;  %s1927_s12 = smov [#allocation6]  }
 0x4f4   : > { %s1795_s0 = sshll.u32 %s1927_s12, 4  ;;  %s1796_s0 = int_to_ptr.vmem [resolvable:$false] %s1795_s0 }
 0x4f5   : > { %s1797_s10 = scalar_lea.vmem %s1796_s0, 512  ;;  %p1798_p7 = scmp.lt.s32.totalorder %s2569_s8, %s1796_s0 }
 0x4f6   : > { %p2686_p0 = scmp.ne.s32.totalorder %s2683_s9, 0  ;;  %p1799_p11 = scmp.lt.s32.totalorder %s1797_s10, %s1791_s14 }
 0x4f7   : > { %s2685_s24 = smov %s2684_s30  ;;  %s2567_s22 = scalar_lea.hbm %s2684_s30, %s1468_s20 }
 0x4f8   : > { %p1793_p3 = pnand %p1792_p13, %p2686_p0  ;;  %p1800_p4 = por %p1799_p11, %p1798_p7 }
 0x4fa   : > { %p1794_p5 = pneg %p1793_p3 }
 0x4fc   : > { %p1801_p8 = pnand %p1800_p4, %p1794_p5 }
 0x5b3   : > { %v1240_v11 = vpop.f32.mrb[4].mxu1 }
 0x5b4   : > { %v1245_v1 = vadd.f32 %v1240_v11, %v1172_v54  ;;  %v1242_v16 = vpop.f32.mrb[5].mxu1 }
 0x5b5   : > { %v1246_v40 = vadd.f32 %v1242_v16, %v1173_v3 }
 0x5b6   : > { %1247 = vst [vmem:[%s2164_s7] sm:$0xff] %v1245_v1 }
 0x5b7   : > { %1248 = vst [vmem:[%s2164_s7 + $0x8] sm:$0xff] %v1246_v40 }
 0x5b8   : > { %1804 = shalt.err (!%p1801_p8)
}
 0x5b9   : > { %s1805_s17 = scalar_lea.hbm %s2567_s22, 256  ;;  %s1809_s11 = scalar_lea.hbm %s2685_s24, 512 }
 0x5ba   : > { %p1806_p10 = scmp.ne.s32.totalorder %s2567_s22, %s1805_s17  ;;  %p1810_p6 = scmp.lt.u32.totalorder %s2567_s22, %s2685_s24 }
 0x5bb   : > { %p1811_p1 = scmp.lt.u32.totalorder %s1809_s11, %s1805_s17  ;;  %p1813_p13 = scmp.lt.u32.totalorder %s1805_s17, %s2567_s22 }
 0x5bc   : > { %p1807_p2 = pnand %p1806_p10, %p2686_p0 }
 0x5bd   : > { %p1812_p12 = por %p1811_p1, %p1810_p6 }
 0x5be   : > { %p1808_p9 = pneg %p1807_p2 }
 0x5bf   : > { %p1814_p3 = por %p1813_p13, %p1812_p12 }
 0x5c1   : > { %p1815_p5 = pnand %p1814_p3, %p1808_p9 }
 0x5c3   : > { %1818 = shalt.err (!%p1815_p5)
}
 0x5c4   : > { %1525 = dma.vmem_to_hbm [thread:$0]  (%p2686_p0), %s2569_s8, 256, %s2567_s22, %s1250_s19  }
 0x5c5 PF: > { %s2687_s26 = sld [smem:[#allocation12_spill]]  ;;  %p1541_p7 = scmp.ge.s32.totalorder %s1917_s15, 2 }
 0x5c6   : > { %p2688_p11 = scmp.ne.s32.totalorder %s2673_s16, 0 }
 0x5c8   : > { %p1534_p4 = pnand %p1541_p7, %p2688_p11 }
 0x5cb   : > { %s1300_s30 = sand.u32 1, %s2687_s26  }
 0x5cc   : > { %s1301_s14 = scalar_lea.sflag [#allocation5], %s1300_s30 }
 0x5cd   : > { %1868 = dma.done.wait (!%p1534_p4), %s1301_s14, 256  }
 0x5ce   : > { %1870 = vsyncadd (!%p1534_p4), %s1301_s14, 4294967040  ;;  %s1309_s12 = sand.u32 1, %s1877_s27   ;;  %p2689_p8 = scmp.ne.s32.totalorder %s2676_s18, 0 }
 0x5cf   : > { %s1310_s9 = scalar_lea.sflag [#allocation8], %s1309_s12 }
 0x5d0   : > { %p1537_p10 = pnand %p1541_p7, %p2689_p8 }
 0x5d2   : > { %1872 = dma.done.wait (!%p1537_p10), %s1310_s9, 4096  }
 0x5d3   : > { %1874 = vsyncadd (!%p1537_p10), %s1310_s9, 4294963200  ;;  %s28_s15 = sadd.s32 1, %s1917_s15   ;;  %s2690_s30 = sld [smem:[#allocation13_spill]] }
 0x5d4   : > { %p25_p0 = scmp.ge.s32.totalorder %s28_s15, 10   ;;  %s2691_s9 = sld [smem:[#allocation14_spill]] }
 0x5d5   : > { %s2692_s10 = sld [smem:[#allocation20_spill]]  ;;  %s2693_s11 = sld [smem:[#allocation15_spill]] }
 0x5d6   : > { %s2694_s12 = sld [smem:[#allocation16_spill]]  ;;  %s2695_s13 = sld [smem:[#allocation17_spill]] }
 0x5d7   : > { %s2696_s14 = sld [smem:[#allocation18_spill]]  ;;  %s2697_s27 = smov %s1881_s28 }
 0x5d8   : > { %s2698_s28 = smov %s1885_s29  ;;  %s2699_s29 = smov %s2084_s25 }
 0x5d9   :  { %27 = sbr.rel (!%p25_p0) target bundleno = 15 (0xf), region = 117 }
 0x5e0   :  { %1315 = vsyncpa [#allocation4], 1 }
 0x5e1   :  { %1317 = vsyncpa [#allocation4 + $0x1], 1 }
 0x5e2   :  { %1318 = vsyncpa [#allocation5], 1 }
 0x5e3   :  { %1320 = vsyncpa [#allocation5 + $0x1], 1 }
 0x5e4   :  { %1321 = vsyncpa [#allocation8], 1 }
 0x5e5   :  { %1323 = vsyncpa [#allocation8 + $0x1], 1 }

</bundles_post_ra>
